<compile_context>
chip_gen: v7x
topology: tpu7x:2x2x1
jax: 0.10.0
libtpu: 0.0.40
codegen_flags: <defaults>
</compile_context>

<pallas_src>
import jax
import jax.numpy as jnp
from jax.experimental import pallas as pl
from jax.experimental.pallas import tpu as pltpu


def _round_up(x, m):
    return ((x + m - 1) // m) * m


def _vmem_budgets():
    """Generation-aware (double-buffered-input budget, vmem_limit_bytes)."""
    try:
        cap = int(pltpu.get_tpu_info().vmem_capacity_bytes)
    except Exception:  # be conservative if the query is unavailable
        cap = 64 * 1024 * 1024  # v7x per-TensorCore VMEM
    if cap >= 128 * 1024 * 1024:  # v5e / v6e
        return 16 * 1024 * 1024, 64 * 1024 * 1024
    return 10 * 1024 * 1024, 48 * 1024 * 1024  # v7x (64 MiB physical VMEM)


def _choose_tile_n(n, c, itemsize, reduction):
    budget, vmem_limit = _vmem_budgets()
    c_pad = _round_up(c, 128)  # VMEM pads the lane (minor) dim to 128
    # Double-buffered VMEM bytes per logical row:
    #   logits tile row (lane-padded) + (tile_n, 1) int32 targets column (lane-padded).
    per_row = 2 * (c_pad * itemsize + 128 * 4)
    if reduction not in ("mean", "sum"):
        per_row += 2 * 128 * 4  # (tile_n, 1) f32 output column, double-buffered
    tile_n = budget // per_row
    tile_n = min(tile_n, max(8, (n // 8) * 8))  # never request a block taller than N
    tile_n = max(8, (tile_n // 8) * 8)
    # Make sure even the minimum tile fits (very large C).
    vmem_limit = max(vmem_limit, 2 * tile_n * (c_pad * itemsize + 128 * 4) + (8 << 20))
    return tile_n, vmem_limit


def _make_kernel(*, gamma, reduction, n_valid, tile_n, has_alpha, ragged):
    def kernel(*refs):
        logits_ref = refs[0]
        targets_ref = refs[1]
        idx = 2
        if has_alpha:
            alpha_ref = refs[idx]
            idx += 1
        out_ref = refs[idx]

        x = logits_ref[...].astype(jnp.float32)  # (tile_n, C)
        tgt = targets_ref[...]                    # (tile_n, 1) int32
        tn, c = x.shape

        col = jax.lax.broadcasted_iota(jnp.int32, (tn, c), 1)
        onehot = col == tgt                       # (tile_n, C)

        # Numerically-stable log-sum-exp cross entropy.
        m = jnp.max(x, axis=-1, keepdims=True)
        lse = m + jnp.log(jnp.sum(jnp.exp(x - m), axis=-1, keepdims=True))
        picked = jnp.sum(jnp.where(onehot, x, 0.0), axis=-1, keepdims=True)
        ce = jnp.maximum(lse - picked, 0.0)       # clamp tiny FP negatives
        pt = jnp.exp(picked - lse)                # == exp(-ce)

        one_minus_pt = 1.0 - pt
        if gamma == 2:
            w = jnp.square(one_minus_pt)
        elif isinstance(gamma, int) and gamma >= 0:
            w = jax.lax.integer_pow(one_minus_pt, gamma)
        else:
            w = jnp.maximum(one_minus_pt, 0.0) ** gamma
        focal = w * ce                            # (tile_n, 1)

        if has_alpha:
            a_row = alpha_ref[...].astype(jnp.float32)  # (1, C), resident
            alpha_t = jnp.sum(jnp.where(onehot, a_row, 0.0), axis=-1, keepdims=True)
            focal = alpha_t * focal

        if reduction in ("mean", "sum"):
            if ragged:
                # Mask garbage rows of the ragged last block before reducing.
                # (jnp.where drops NaN/Inf from the unselected branch.)
                row = (jax.lax.broadcasted_iota(jnp.int32, (tn, 1), 0)
                       + pl.program_id(0) * tile_n)
                focal = jnp.where(row < n_valid, focal, 0.0)
            part = jnp.sum(focal)                 # per-tile partial sum
            out_ref[...] = jnp.broadcast_to(part, (1, 1, 128))
        else:
            # Out-of-range rows of a ragged last block are clipped on writeback.
            out_ref[...] = focal

    return kernel


def focal_loss(logits, targets, gamma=2, alpha=None, reduction="mean", tile_n=None):
    """Pallas TPU implementation of FocalLoss.forward.

    logits:  (N, C) float
    targets: (N,)   int  (values in [0, C); out-of-range values are undefined)
    alpha:   optional (C,) per-class weights
    """
    n, c = logits.shape
    itemsize = jnp.dtype(logits.dtype).itemsize
    if tile_n is None:
        tile_n, vmem_limit = _choose_tile_n(n, c, itemsize, reduction)
    else:
        tile_n = max(8, (int(tile_n) // 8) * 8)
        _, vmem_limit = _vmem_budgets()

    num_tiles = (n + tile_n - 1) // tile_n
    ragged = (n % tile_n) != 0

    targets2d = targets.astype(jnp.int32).reshape(n, 1)   # free metadata reshape

    has_alpha = alpha is not None
    inputs = [logits, targets2d]
    in_specs = [
        pl.BlockSpec((tile_n, c), lambda i: (i, 0)),
        pl.BlockSpec((tile_n, 1), lambda i: (i, 0)),
    ]
    if has_alpha:
        alpha_row = jnp.asarray(alpha, dtype=jnp.float32).reshape(1, c)
        inputs.append(alpha_row)
        in_specs.append(pl.BlockSpec((1, c), lambda i: (0, 0)))

    if reduction in ("mean", "sum"):
        # Per-tile partial sums -> independent ("parallel") grid steps.
        out_shape = jax.ShapeDtypeStruct((num_tiles, 1, 128), jnp.float32)
        out_spec = pl.BlockSpec((1, 1, 128), lambda i: (i, 0, 0))
    else:
        out_shape = jax.ShapeDtypeStruct((n, 1), jnp.float32)
        out_spec = pl.BlockSpec((tile_n, 1), lambda i: (i, 0))

    kernel = _make_kernel(gamma=gamma, reduction=reduction, n_valid=n,
                          tile_n=tile_n, has_alpha=has_alpha, ragged=ragged)

    res = pl.pallas_call(
        kernel,
        out_shape=out_shape,
        grid_spec=pltpu.PrefetchScalarGridSpec(
            num_scalar_prefetch=0,
            grid=(num_tiles,),
            in_specs=in_specs,
            out_specs=out_spec,
        ),
        compiler_params=pltpu.CompilerParams(
            dimension_semantics=("parallel",),
            vmem_limit_bytes=int(vmem_limit),
        ),
    )(*inputs)

    if reduction == "mean":
        return jnp.sum(res[:, 0, 0]) / jnp.float32(n)
    if reduction == "sum":
        return jnp.sum(res[:, 0, 0])
    return res[:, 0]


def _reference_focal_loss(logits, targets, gamma=2, alpha=None, reduction="mean"):
    logp = jax.nn.log_softmax(logits.astype(jnp.float32), axis=-1)
    ce = -jnp.take_along_axis(logp, targets[:, None], axis=-1)[:, 0]
    pt = jnp.exp(-ce)
    fl = (1.0 - pt) ** gamma * ce
    if alpha is not None:
        fl = jnp.asarray(alpha, dtype=jnp.float32)[targets] * fl
    if reduction == "mean":
        return fl.mean()
    if reduction == "sum":
        return fl.sum()
    return fl


if __name__ == "__main__":
    key = jax.random.PRNGKey(0)
    k1, k2, k3, k4, k5, k6 = jax.random.split(key, 6)

    # Case 1: default module config (gamma=2, alpha=None, reduction='mean'), single tile.
    N, C = 8, 32
    logits = jax.random.normal(k1, (N, C), dtype=jnp.float32)
    targets = jax.random.randint(k2, (N,), 0, C, dtype=jnp.int32)
    out = jax.block_until_ready(focal_loss(logits, targets))
    ref = _reference_focal_loss(logits, targets)
    assert jnp.allclose(out, ref, atol=1e-5, rtol=1e-5), (out, ref)

    # Case 2: multi-tile ragged grid (no input padding) + alpha weights + 'sum'.
    N2, C2 = 40, 32
    logits2 = jax.random.normal(k3, (N2, C2), dtype=jnp.float32)
    targets2 = jax.random.randint(k4, (N2,), 0, C2, dtype=jnp.int32)
    alpha = jnp.linspace(0.5, 1.5, C2, dtype=jnp.float32)
    out2 = jax.block_until_ready(
        focal_loss(logits2, targets2, gamma=2, alpha=alpha, reduction="sum", tile_n=16))
    ref2 = _reference_focal_loss(logits2, targets2, gamma=2, alpha=alpha, reduction="sum")
    assert jnp.allclose(out2, ref2, atol=1e-4, rtol=1e-5), (out2, ref2)

    # Case 3: reduction='none' with a ragged last tile (OOB rows clipped on writeback).
    out3 = jax.block_until_ready(
        focal_loss(logits2, targets2, gamma=2, alpha=None, reduction="none", tile_n=16))
    ref3 = _reference_focal_loss(logits2, targets2, gamma=2, alpha=None, reduction="none")
    assert jnp.allclose(out3, ref3, atol=1e-5, rtol=1e-5), (out3, ref3)

    # Case 4: auto tile sizing, N not a multiple of the tile (ragged) + alpha + 'mean'.
    N4, C4 = 37, 16
    logits4 = jax.random.normal(k5, (N4, C4), dtype=jnp.float32)
    targets4 = jax.random.randint(k6, (N4,), 0, C4, dtype=jnp.int32)
    alpha4 = jnp.linspace(0.25, 2.0, C4, dtype=jnp.float32)
    out4 = jax.block_until_ready(
        focal_loss(logits4, targets4, gamma=2, alpha=alpha4, reduction="mean"))
    ref4 = _reference_focal_loss(logits4, targets4, gamma=2, alpha=alpha4, reduction="mean")
    assert jnp.allclose(out4, ref4, atol=1e-5, rtol=1e-5), (out4, ref4)

    print("KERNEL_OK")
</pallas_src>

<mosaic_0001>
module attributes {stable_mosaic.version = 11 : i64} {
  func.func @kernel(%arg0: i32, %arg1: memref<8x32xf32, #tpu.memory_space<vmem>>, %arg2: memref<8x1xi32, #tpu.memory_space<vmem>>, %arg3: memref<1x1x128xf32, #tpu.memory_space<vmem>>) attributes {dimension_semantics = [#tpu.dimension_semantics<parallel>], iteration_bounds = array<i64: 1>, scalar_prefetch = 0 : i64, scratch_operands = 0 : i64, tpu.core_type = #tpu.core_type<tc>, window_params = [{transform_indices = @transform_0, window_bounds = array<i64: 8, 32>}, {transform_indices = @transform_1, window_bounds = array<i64: 8, 1>}, {transform_indices = @transform_2, window_bounds = array<i64: 1, 1, 128>}]} {
    %c0 = arith.constant 0 : index
    %c0_0 = arith.constant 0 : index
    %0 = vector.load %arg1[%c0, %c0_0] : memref<8x32xf32, #tpu.memory_space<vmem>>, vector<8x32xf32>
    %c0_1 = arith.constant 0 : index
    %c0_2 = arith.constant 0 : index
    %1 = vector.load %arg2[%c0_1, %c0_2] : memref<8x1xi32, #tpu.memory_space<vmem>>, vector<8x1xi32>
    %2 = tpu.iota {dimensions = array<i32: 1>} : vector<8x32xi32>
    %3 = vector.broadcast %1 : vector<8x1xi32> to vector<8x32xi32>
    %4 = arith.cmpi eq, %2, %3 : vector<8x32xi32>
    %cst = arith.constant dense<0xFF800000> : vector<8xf32>
    %5 = vector.multi_reduction <maximumf>, %0, %cst [1] : vector<8x32xf32> to vector<8xf32>
    %6 = vector.shape_cast %5 : vector<8xf32> to vector<8x1xf32>
    %7 = vector.broadcast %6 : vector<8x1xf32> to vector<8x32xf32>
    %8 = arith.subf %0, %7 : vector<8x32xf32>
    %9 = math.exp %8 : vector<8x32xf32>
    %cst_3 = arith.constant dense<0.000000e+00> : vector<8xf32>
    %10 = vector.multi_reduction <add>, %9, %cst_3 [1] : vector<8x32xf32> to vector<8xf32>
    %11 = vector.shape_cast %10 : vector<8xf32> to vector<8x1xf32>
    %12 = math.log %11 : vector<8x1xf32>
    %13 = arith.addf %6, %12 : vector<8x1xf32>
    %cst_4 = arith.constant 0.000000e+00 : f32
    %14 = vector.broadcast %cst_4 : f32 to vector<8x32xf32>
    %15 = arith.select %4, %0, %14 : vector<8x32xi1>, vector<8x32xf32>
    %cst_5 = arith.constant dense<0.000000e+00> : vector<8xf32>
    %16 = vector.multi_reduction <add>, %15, %cst_5 [1] : vector<8x32xf32> to vector<8xf32>
    %17 = vector.shape_cast %16 : vector<8xf32> to vector<8x1xf32>
    %18 = arith.subf %13, %17 : vector<8x1xf32>
    %cst_6 = arith.constant 0.000000e+00 : f32
    %19 = vector.broadcast %cst_6 : f32 to vector<8x1xf32>
    %20 = arith.maximumf %18, %19 : vector<8x1xf32>
    %21 = arith.subf %17, %13 : vector<8x1xf32>
    %22 = math.exp %21 : vector<8x1xf32>
    %cst_7 = arith.constant 1.000000e+00 : f32
    %23 = vector.broadcast %cst_7 : f32 to vector<8x1xf32>
    %24 = arith.subf %23, %22 : vector<8x1xf32>
    %25 = arith.mulf %24, %24 : vector<8x1xf32>
    %26 = arith.mulf %25, %20 : vector<8x1xf32>
    %27 = vector.shape_cast %26 : vector<8x1xf32> to vector<1x8x1xf32>
    %cst_8 = arith.constant dense<0.000000e+00> : vector<1xf32>
    %28 = vector.multi_reduction <add>, %27, %cst_8 [1, 2] : vector<1x8x1xf32> to vector<1xf32>
    %29 = vector.shape_cast %28 : vector<1xf32> to vector<1x1x1xf32>
    %30 = vector.extract %29[0, 0, 0] : f32 from vector<1x1x1xf32>
    %31 = vector.broadcast %30 : f32 to vector<1x1x128xf32>
    %c0_9 = arith.constant 0 : index
    %c0_10 = arith.constant 0 : index
    %c0_11 = arith.constant 0 : index
    %32 = vector.load %arg3[%c0_9, %c0_10, %c0_11] : memref<1x1x128xf32, #tpu.memory_space<vmem>>, vector<1x1x128xf32>
    tpu.vector_store %arg3[%c0_9, %c0_10, %c0_11], %31 {strides = array<i32>} : memref<1x1x128xf32, #tpu.memory_space<vmem>>, vector<1x1x128xf32>,
    return
  }
  func.func @transform_0(%arg0: i32) -> (i32, i32) {
    %c0_i32 = arith.constant 0 : i32
    %c0_i32_0 = arith.constant 0 : i32
    return %arg0, %c0_i32 : i32, i32
  }
  func.func @transform_1(%arg0: i32) -> (i32, i32) {
    %c0_i32 = arith.constant 0 : i32
    %c0_i32_0 = arith.constant 0 : i32
    return %arg0, %c0_i32 : i32, i32
  }
  func.func @transform_2(%arg0: i32) -> (i32, i32, i32) {
    %c0_i32 = arith.constant 0 : i32
    %c0_i32_0 = arith.constant 0 : i32
    %c0_i32_1 = arith.constant 0 : i32
    return %arg0, %c0_i32, %c0_i32_0 : i32, i32, i32
  }
}

</mosaic_0001>

<bundles_post_ra>
// kernel: tpu_custom_call.1
= control target key start
LH: loop header
LB: loop body
LE: loop exit
PB: predicated region body
PF: predicated region fallthrough
CT: control target
= control target key end

     0   :  { %vm20_vm0 = vcmask 261120   ;;  %s145_s0 = inlined_call_operand.vmem [shape: f32[8,32], index: 0, kind: input, shape index: {}]   ;;  %s146_s1 = inlined_call_operand.vmem [shape: s32[8,1], index: 1, kind: input, shape index: {}]   ;;  %s147_s2 = inlined_call_operand.hbm [shape: f32[1,1,128], index: 2, kind: output, shape index: {}]  }
   0x1   :  { %v12_v0 = vld [vmem:[%s145_s0] sm:$0xff] }
   0x2   :  { %7 = vsyncpa [#allocation3], 0  ;;  %v21_v1 = vsel %vm20_vm0, %v12_v0, -inf  ;;  %v107_v2 = vmov 0   ;;  %v13_v3 = vld [vmem:[%s146_s1] sm:$0xff]  ;;  %v14_v7 = vlaneseq  ;;  %vm45_vm2 = vcmask 7168  }
   0x3   :  { %76 = vset.pattern.permute.xlu0 %v107_v2  ;;  %s108_s0 = smov [#allocation2]  }
   0x4   :  { %22 = vmax.xlane.f32.xlu0 %v21_v1  ;;  %v15_v8 = vand.u32 127, %v14_v7  ;;  %s64_s1 = sshll.u32 %s108_s0, 4  ;;  %s65_s1 = int_to_ptr.vmem [resolvable:$true] %s64_s1 }
   0x5   :  { %s83_s14 = scalar_lea.vmem %s65_s1, 16  ;;  %s87_s15 = scalar_lea.vmem %s65_s1, 32 }
   0x6   :  { %p84_p0 = scmp.ne.s32.totalorder %s65_s1, %s83_s14  ;;  %p88_p1 = scmp.lt.s32.totalorder %s65_s1, %s65_s1 }
   0x7   :  { %p89_p2 = scmp.lt.s32.totalorder %s87_s15, %s83_s14 }
   0x9   :  { %p90_p3 = por %p89_p2, %p88_p1 }
   0xb   :  { %p91_p4 = pnand %p90_p3, %p84_p0 }
  0x1a   :  { %17 = vperm.xlu0 %76, %v13_v3  }
  0x91   :  { %v23_v4 = vpop.xlane.xlu0 %22 }
  0x92   :  { %v24_v5 = vsub.f32 %v12_v0, %v23_v4 }
  0x94   :  { %v25_v6 = vmul.f32 1.442695, %v24_v5 }
  0x96   :  { %77 = vpow2.f32 %v25_v6 }
  0x99   :  { %v18_v9 = vpop.permute.xlu0 %17 }
  0x9a   :  { %vm19_vm1 = vcmp.eq.s32.totalorder %v15_v8, %v18_v9 }
  0x9b   :  { %v33_v11 = vsel %vm19_vm1, %v12_v0, 0.0 }
  0x9c   :  { %v34_v13 = vsel %vm20_vm0, %v33_v11, 0.0 }
  0xa0   :  { %v78_v10 = vpop.eup %77 }
  0xa1   :  { %v27_v12 = vsel %vm20_vm0, %v78_v10, 0.0 }
  0xa2   :  { %28 = vadd.xlane.f32.xlu1 %v27_v12 }
  0xa6   :  { %35 = vadd.xlane.f32.xlu1 %v34_v13 }
 0x12f   :  { %v29_v14 = vpop.xlane.xlu1 %28 }
 0x130   :  { %79 = vlog2.f32 %v29_v14 }
 0x133   :  { %v36_v17 = vpop.xlane.xlu1 %35 }
 0x13a   :  { %v80_v15 = vpop.eup %79 }
 0x13b   :  { %v31_v16 = vmul.f32 0.6931472, %v80_v15 }
 0x13d   :  { %v32_v18 = vadd.f32 %v31_v16, %v23_v4 }
 0x13f   :  { %v39_v19 = vsub.f32 %v36_v17, %v32_v18  ;;  %v37_v21 = vsub.f32 %v32_v18, %v36_v17 }
 0x141   :  { %v40_v20 = vmul.f32 1.442695, %v39_v19  ;;  %v38_v24 = vmax.f32 %v37_v21, 0.0 }
 0x143   :  { %81 = vpow2.f32 %v40_v20 }
 0x14d   :  { %v82_v22 = vpop.eup %81 }
 0x14e   :  { %v42_v23 = vsub.f32 1.0, %v82_v22 }
 0x150   :  { %v43_v25 = vmul.f32 %v42_v23, %v42_v23 }
 0x152   :  { %v44_v26 = vmul.f32 %v43_v25, %v38_v24 }
 0x154   :  { %v46_v27 = vsel %vm45_vm2, %v44_v26, 0.0 }
 0x155   :  { %47 = vadd.xlane.f32.xlu1 %v46_v27 }
 0x1e2   :  { %v48_v28 = vpop.xlane.xlu1 %47 }
 0x1e3   :  { %v49_v29 = vrot.slane %v48_v28, 4 }
 0x1e5   :  { %v50_v30 = vadd.f32 %v49_v29, %v48_v28 }
 0x1e7   :  { %v51_v31 = vrot.slane %v50_v30, 2 }
 0x1e9   :  { %v52_v32 = vadd.f32 %v51_v31, %v50_v30 }
 0x1eb   :  { %v53_v33 = vrot.slane %v52_v32, 1 }
 0x1ed   :  { %v54_v34 = vadd.f32 %v53_v33, %v52_v32 }
 0x1ef   :  { %72 = vpush %v54_v34 }
 0x220   :  { %s73_s13 = spop %72 }
 0x221   :  { %v56_v35 = vstv %s73_s13 }
 0x222   :  { %57 = vst [vmem:[#allocation2] sm:$0x1] %v56_v35 }
 0x223   :  { %94 = shalt.err (!%p91_p4)
}
 0x224   :  { %s95_s18 = scalar_lea.hbm %s147_s2, 16 }
 0x225   :  { %p96_p5 = scmp.ne.s32.totalorder %s147_s2, %s95_s18  ;;  %p99_p6 = scmp.lt.u32.totalorder %s95_s18, %s147_s2 }
 0x227   :  { %p101_p7 = pnand %p99_p6, %p96_p5 }
 0x229   :  { %104 = shalt.err (!%p101_p7)
}
 0x22a   :  { %67 = dma.vmem_to_hbm [thread:$0]  %s65_s1, 16, %s147_s2, [#allocation3]  }
 0x22b   :  { %105 = dma.done.wait [#allocation3], 16  }
 0x22c   :  { %106 = vsyncadd [#allocation3], 4294967280 }
 0x22d   :  { %71 = vsyncpa [#allocation3], 1 }

</bundles_post_ra>
